<compile_context>
chip_gen: v5e
topology: v5e:2x2
jax: 0.10.0
libtpu: 0.0.40
codegen_flags: <defaults>
</compile_context>

<pallas_src>
import jax
import jax.numpy as jnp
from jax.experimental import pallas as pl
from jax.experimental.pallas import tpu as pltpu


def _round_up(x, m):
    return ((x + m - 1) // m) * m


def _choose_tm(m_pad8, tm_max=1024):
    """Pick an M-tile: as large as possible (big DMAs) while keeping >= 2 grid
    steps when the problem allows it (v7x has 2 TensorCores)."""
    if m_pad8 >= 2 * tm_max:
        return tm_max
    half = _round_up((m_pad8 + 1) // 2, 8)
    return max(8, min(tm_max, half))


def _qa_kernel(x_ref, w_ref, b_ref, start_ref, end_ref):
    # x_ref: (tm, 768) activation tile
    # w_ref: (768, 2)  weight, transposed to (in, out)
    # b_ref: (1, 2)    bias
    # start_ref / end_ref: (tm, 1) logit planes
    acc = jnp.dot(x_ref[...], w_ref[...], preferred_element_type=jnp.float32)
    acc = acc + b_ref[...]
    start_ref[...] = acc[:, 0:1].astype(start_ref.dtype)
    end_ref[...] = acc[:, 1:2].astype(end_ref.dtype)


def mrc_dense_forward(sequence_out, weight, bias, *, tm_max=1024):
    """sequence_out: (B, S, 768); weight: (2, 768); bias: (2,).
    Returns (start_logits, end_logits), each (B, S). Works with f32 or bf16
    activations/weights (accumulation is always f32 on the MXU)."""
    B, S, H = sequence_out.shape
    assert H == 768
    M = B * S

    m_pad8 = _round_up(M, 8)
    tm = _choose_tm(m_pad8, tm_max)
    M_pad = _round_up(M, tm)

    x2d = sequence_out.reshape(M, H)
    if M_pad != M:
        x2d = jnp.pad(x2d, ((0, M_pad - M), (0, 0)))
    w_t = weight.T                     # (768, 2)
    b2d = bias.reshape(1, 2).astype(jnp.float32)

    itemsize = jnp.dtype(x2d.dtype).itemsize
    cost = pl.CostEstimate(
        flops=2 * M_pad * H * 2,
        transcendentals=0,
        bytes_accessed=M_pad * H * itemsize + H * 2 * 4 + M_pad * 2 * 4,
    )

    out_dtype = sequence_out.dtype
    start2d, end2d = pl.pallas_call(
        _qa_kernel,
        out_shape=(
            jax.ShapeDtypeStruct((M_pad, 1), out_dtype),
            jax.ShapeDtypeStruct((M_pad, 1), out_dtype),
        ),
        grid_spec=pltpu.PrefetchScalarGridSpec(
            num_scalar_prefetch=0,
            grid=(M_pad // tm,),
            in_specs=[
                pl.BlockSpec((tm, H), lambda i: (i, 0)),   # activations tile
                pl.BlockSpec((H, 2), lambda i: (0, 0)),    # full weight
                pl.BlockSpec((1, 2), lambda i: (0, 0)),    # bias
            ],
            out_specs=[
                pl.BlockSpec((tm, 1), lambda i: (i, 0)),   # start logits
                pl.BlockSpec((tm, 1), lambda i: (i, 0)),   # end logits
            ],
        ),
        compiler_params=pltpu.CompilerParams(
            dimension_semantics=("parallel",)),
        cost_estimate=cost,
    )(x2d, w_t, b2d)

    start_logits = start2d[:M, 0].reshape(B, S)
    end_logits = end2d[:M, 0].reshape(B, S)
    return start_logits, end_logits


if __name__ == "__main__":
    key = jax.random.PRNGKey(0)
    k_x, k_w, k_b = jax.random.split(key, 3)

    B, S, H = 2, 8, 768
    sequence_out = jax.random.normal(k_x, (B, S, H), dtype=jnp.float32)

    # nn.Linear(768, 2)-style parameters: weight (2, 768), bias (2,),
    # uniform(-1/sqrt(768), 1/sqrt(768)) like torch's default init.
    bound = 1.0 / (H ** 0.5)
    weight = jax.random.uniform(k_w, (2, H), jnp.float32, -bound, bound)
    bias = jax.random.uniform(k_b, (2,), jnp.float32, -bound, bound)

    start_logits, end_logits = mrc_dense_forward(sequence_out, weight, bias)
    jax.block_until_ready((start_logits, end_logits))

    # Reference check against plain JAX matmul.
    ref = sequence_out.reshape(-1, H) @ weight.T + bias
    ref = ref.reshape(B, S, 2)
    assert start_logits.shape == (B, S) and end_logits.shape == (B, S)
    assert jnp.allclose(start_logits, ref[..., 0], atol=1e-5, rtol=1e-5)
    assert jnp.allclose(end_logits, ref[..., 1], atol=1e-5, rtol=1e-5)

    print("KERNEL_OK")
</pallas_src>

<mosaic_0001>
module attributes {stable_mosaic.version = 11 : i64} {
  func.func @_qa_kernel(%arg0: i32, %arg1: memref<8x768xf32, #tpu.memory_space<vmem>>, %arg2: memref<768x2xf32, #tpu.memory_space<vmem>>, %arg3: memref<1x2xf32, #tpu.memory_space<vmem>>, %arg4: memref<8x1xf32, #tpu.memory_space<vmem>>, %arg5: memref<8x1xf32, #tpu.memory_space<vmem>>) attributes {dimension_semantics = [#tpu.dimension_semantics<parallel>], iteration_bounds = array<i64: 2>, scalar_prefetch = 0 : i64, scratch_operands = 0 : i64, tpu.core_type = #tpu.core_type<tc>, window_params = [{transform_indices = @transform_0, window_bounds = array<i64: 8, 768>}, {pipeline_mode = #tpu.pipeline_mode<synchronous>, transform_indices = @transform_1, window_bounds = array<i64: 768, 2>}, {pipeline_mode = #tpu.pipeline_mode<synchronous>, transform_indices = @transform_2, window_bounds = array<i64: 1, 2>}, {transform_indices = @transform_3, window_bounds = array<i64: 8, 1>}, {transform_indices = @transform_4, window_bounds = array<i64: 8, 1>}]} {
    %c0 = arith.constant 0 : index
    %c0_0 = arith.constant 0 : index
    %0 = vector.load %arg1[%c0, %c0_0] : memref<8x768xf32, #tpu.memory_space<vmem>>, vector<8x768xf32>
    %c0_1 = arith.constant 0 : index
    %c0_2 = arith.constant 0 : index
    %1 = vector.load %arg2[%c0_1, %c0_2] : memref<768x2xf32, #tpu.memory_space<vmem>>, vector<768x2xf32>
    %cst = arith.constant dense<0.000000e+00> : vector<8x2xf32>
    %2 = tpu.matmul %0, %1, %cst {dimension_numbers = #tpu.dot_dimension_numbers<[1], [0], [0], [1], [0, 0, 1, 1], [], []>} : vector<8x768xf32>, vector<768x2xf32>, vector<8x2xf32> -> vector<8x2xf32>
    %c0_3 = arith.constant 0 : index
    %c0_4 = arith.constant 0 : index
    %3 = vector.load %arg3[%c0_3, %c0_4] : memref<1x2xf32, #tpu.memory_space<vmem>>, vector<1x2xf32>
    %4 = vector.broadcast %3 : vector<1x2xf32> to vector<8x2xf32>
    %5 = arith.addf %2, %4 : vector<8x2xf32>
    %6 = vector.extract_strided_slice %5 {offsets = [0, 0], sizes = [8, 1], strides = [1, 1]} : vector<8x2xf32> to vector<8x1xf32>
    %c0_5 = arith.constant 0 : index
    %c0_6 = arith.constant 0 : index
    %7 = vector.load %arg4[%c0_5, %c0_6] : memref<8x1xf32, #tpu.memory_space<vmem>>, vector<8x1xf32>
    tpu.vector_store %arg4[%c0_5, %c0_6], %6 {strides = array<i32>} : memref<8x1xf32, #tpu.memory_space<vmem>>, vector<8x1xf32>,
    %8 = vector.extract_strided_slice %5 {offsets = [0, 1], sizes = [8, 1], strides = [1, 1]} : vector<8x2xf32> to vector<8x1xf32>
    %c0_7 = arith.constant 0 : index
    %c0_8 = arith.constant 0 : index
    %9 = vector.load %arg5[%c0_7, %c0_8] : memref<8x1xf32, #tpu.memory_space<vmem>>, vector<8x1xf32>
    tpu.vector_store %arg5[%c0_7, %c0_8], %8 {strides = array<i32>} : memref<8x1xf32, #tpu.memory_space<vmem>>, vector<8x1xf32>,
    return
  }
  func.func @transform_0(%arg0: i32) -> (i32, i32) {
    %c0_i32 = arith.constant 0 : i32
    %c0_i32_0 = arith.constant 0 : i32
    return %arg0, %c0_i32 : i32, i32
  }
  func.func @transform_1(%arg0: i32) -> (i32, i32) {
    %c0_i32 = arith.constant 0 : i32
    %c0_i32_0 = arith.constant 0 : i32
    %c0_i32_1 = arith.constant 0 : i32
    return %c0_i32, %c0_i32_0 : i32, i32
  }
  func.func @transform_2(%arg0: i32) -> (i32, i32) {
    %c0_i32 = arith.constant 0 : i32
    %c0_i32_0 = arith.constant 0 : i32
    %c0_i32_1 = arith.constant 0 : i32
    return %c0_i32, %c0_i32_0 : i32, i32
  }
  func.func @transform_3(%arg0: i32) -> (i32, i32) {
    %c0_i32 = arith.constant 0 : i32
    %c0_i32_0 = arith.constant 0 : i32
    return %arg0, %c0_i32 : i32, i32
  }
  func.func @transform_4(%arg0: i32) -> (i32, i32) {
    %c0_i32 = arith.constant 0 : i32
    %c0_i32_0 = arith.constant 0 : i32
    return %arg0, %c0_i32 : i32, i32
  }
}

</mosaic_0001>

<bundles_post_ra>
// kernel: tpu_custom_call.1
= control target key start
LH: loop header
LB: loop body
LE: loop exit
PB: predicated region body
PF: predicated region fallthrough
CT: control target
= control target key end

     0   :  { %s579_s15 = smov 0   ;;  %s912_s0 = inlined_call_operand.vmem [shape: f32[16,768], index: 0, kind: input, shape index: {}]   ;;  %s913_s1 = inlined_call_operand.vmem [shape: f32[768,2], index: 1, kind: input, shape index: {}]   ;;  %s914_s2 = inlined_call_operand.vmem [shape: f32[1,2], index: 2, kind: input, shape index: {}]   ;;  %s915_s3 = inlined_call_operand.vmem [shape: f32[16,1], index: 3, kind: output, shape index: {0}]   ;;  %s916_s4 = inlined_call_operand.vmem [shape: f32[16,1], index: 4, kind: output, shape index: {1}]  }
   0x1 LB: > { %s524_s16 = sadd.s32 4294967295, %s551_s15   ;;  %p528_p0 = scmp.ge.s32.totalorder %s551_s15, 1  ;;  %s551_s15 = sphi %s579_s15, %s15_s15  }
   0x2   : > { %p165_p1 = scmp.lt.s32.totalorder %s551_s15, 3 }
   0x4   : > { %p166_p2 = pnand %p528_p0, %p165_p1 }
   0x5   : > { %p724_p3 = scmp.lt.s32.totalorder (!%p166_p2), %s524_s16, 1  ;;  %s553_s29 = smov (!%p166_p2), 127  }
   0x6   : > { %169 = sbr.rel (%p166_p2) target bundleno = 321 (0x141), region = 32 }
   0xb   : > { %v228_v0 = vld [vmem:[%s913_s1 + $0x78] sm:$0xff]  ;;  %v227_v1 = vld [vmem:[%s913_s1 + $0x70] sm:$0xff]  ;;  %v226_v4 = vld [vmem:[%s913_s1 + $0x68] sm:$0xff]  ;;  %s919_s16 = smov (!%p724_p3, %s524_s16), 1  ;;  %vm433_vm0 = vcmask 7168  }
   0xc   : > { %v244_v2 = vld [vmem:[%s913_s1 + $0xf8] sm:$0xff]  ;;  %313 = vmatpush.msra.mxu0 %v228_v0  ;;  %v243_v3 = vld [vmem:[%s913_s1 + $0xf0] sm:$0xff]  ;;  %v242_v5 = vld [vmem:[%s913_s1 + $0xe8] sm:$0xff]  ;;  %s534_s20 = smul.u32 48, %s919_s16  ;;  %s530_s26 = sshll.u32 %s919_s16, 3 }
   0xd   : > { %333 = vmatpush.msra.mxu1 %v244_v2  ;;  %v225_v6 = vld [vmem:[%s913_s1 + $0x60] sm:$0xff]  ;;  %v224_v8 = vld [vmem:[%s913_s1 + $0x58] sm:$0xff]  ;;  %v223_v10 = vld [vmem:[%s913_s1 + $0x50] sm:$0xff]  ;;  %s202_s28 = scalar_lea.vmem %s915_s3, %s530_s26  ;;  %s206_s6 = scalar_lea.vmem %s916_s4, %s530_s26 }
   0xe   : > { %314 = vmatpush.msra.mxu0 %v227_v1  ;;  %v241_v7 = vld [vmem:[%s913_s1 + $0xe0] sm:$0xff]  ;;  %v240_v9 = vld [vmem:[%s913_s1 + $0xd8] sm:$0xff]  ;;  %v239_v12 = vld [vmem:[%s913_s1 + $0xd0] sm:$0xff]  ;;  %s810_s13 = scalar_lea.vmem %s912_s0, %s534_s20 }
   0xf   : > { %334 = vmatpush.msra.mxu1 %v243_v3  ;;  %v260_v11 = vld [vmem:[%s913_s1 + $0x178] sm:$0xff]  ;;  %v259_v13 = vld [vmem:[%s913_s1 + $0x170] sm:$0xff]  ;;  %v258_v15 = vld [vmem:[%s913_s1 + $0x168] sm:$0xff] }
  0x10   : > { %315 = vmatpush.msra.mxu0 %v226_v4  ;;  %353 = vmatpush.msra.mxu2 %v260_v11  ;;  %v276_v14 = vld [vmem:[%s913_s1 + $0x1f8] sm:$0xff]  ;;  %v275_v16 = vld [vmem:[%s913_s1 + $0x1f0] sm:$0xff]  ;;  %v222_v17 = vld [vmem:[%s913_s1 + $0x48] sm:$0xff] }
  0x11   : > { %335 = vmatpush.msra.mxu1 %v242_v5  ;;  %v238_v18 = vld [vmem:[%s913_s1 + $0xc8] sm:$0xff]  ;;  %373 = vmatpush.msra.mxu3 %v276_v14  ;;  %v257_v19 = vld [vmem:[%s913_s1 + $0x160] sm:$0xff]  ;;  %v256_v23 = vld [vmem:[%s913_s1 + $0x158] sm:$0xff] }
  0x12   : > { %316 = vmatpush.msra.mxu0 %v225_v6  ;;  %354 = vmatpush.msra.mxu2 %v259_v13  ;;  %v274_v20 = vld [vmem:[%s913_s1 + $0x1e8] sm:$0xff]  ;;  %v221_v21 = vld [vmem:[%s913_s1 + $0x40] sm:$0xff]  ;;  %v220_v25 = vld [vmem:[%s913_s1 + $0x38] sm:$0xff] }
  0x13   : > { %336 = vmatpush.msra.mxu1 %v241_v7  ;;  %v237_v22 = vld [vmem:[%s913_s1 + $0xc0] sm:$0xff]  ;;  %374 = vmatpush.msra.mxu3 %v275_v16  ;;  %v236_v26 = vld [vmem:[%s913_s1 + $0xb8] sm:$0xff]  ;;  %v255_v27 = vld [vmem:[%s913_s1 + $0x150] sm:$0xff] }
  0x14   : > { %317 = vmatpush.msra.mxu0 %v224_v8  ;;  %355 = vmatpush.msra.mxu2 %v258_v15  ;;  %v273_v24 = vld [vmem:[%s913_s1 + $0x1e0] sm:$0xff]  ;;  %v272_v28 = vld [vmem:[%s913_s1 + $0x1d8] sm:$0xff]  ;;  %v219_v29 = vld [vmem:[%s913_s1 + $0x30] sm:$0xff] }
  0x15   : > { %337 = vmatpush.msra.mxu1 %v240_v9  ;;  %375 = vmatpush.msra.mxu3 %v274_v20  ;;  %v235_v30 = vld [vmem:[%s913_s1 + $0xb0] sm:$0xff]  ;;  %v254_v31 = vld [vmem:[%s913_s1 + $0x148] sm:$0xff]  ;;  %v253_v35 = vld [vmem:[%s913_s1 + $0x140] sm:$0xff] }
  0x16   : > { %318 = vmatpush.msra.mxu0 %v223_v10  ;;  %356 = vmatpush.msra.mxu2 %v257_v19  ;;  %v271_v32 = vld [vmem:[%s913_s1 + $0x1d0] sm:$0xff]  ;;  %v218_v33 = vld [vmem:[%s913_s1 + $0x28] sm:$0xff]  ;;  %v217_v37 = vld [vmem:[%s913_s1 + $0x20] sm:$0xff] }
  0x17   : > { %338 = vmatpush.msra.mxu1 %v239_v12  ;;  %376 = vmatpush.msra.mxu3 %v273_v24  ;;  %v234_v34 = vld [vmem:[%s913_s1 + $0xa8] sm:$0xff]  ;;  %v233_v38 = vld [vmem:[%s913_s1 + $0xa0] sm:$0xff]  ;;  %v252_v39 = vld [vmem:[%s913_s1 + $0x138] sm:$0xff] }
  0x18   : > { %319 = vmatpush.msra.mxu0 %v222_v17  ;;  %357 = vmatpush.msra.mxu2 %v256_v23  ;;  %v270_v36 = vld [vmem:[%s913_s1 + $0x1c8] sm:$0xff]  ;;  %v269_v40 = vld [vmem:[%s913_s1 + $0x1c0] sm:$0xff]  ;;  %v216_v41 = vld [vmem:[%s913_s1 + $0x18] sm:$0xff] }
  0x19   : > { %339 = vmatpush.msra.mxu1 %v238_v18  ;;  %377 = vmatpush.msra.mxu3 %v272_v28  ;;  %v232_v42 = vld [vmem:[%s913_s1 + $0x98] sm:$0xff]  ;;  %v251_v43 = vld [vmem:[%s913_s1 + $0x130] sm:$0xff]  ;;  %v250_v47 = vld [vmem:[%s913_s1 + $0x128] sm:$0xff] }
  0x1a   : > { %320 = vmatpush.msra.mxu0 %v221_v21  ;;  %358 = vmatpush.msra.mxu2 %v255_v27  ;;  %v268_v44 = vld [vmem:[%s913_s1 + $0x1b8] sm:$0xff]  ;;  %v215_v45 = vld [vmem:[%s913_s1 + $0x10] sm:$0xff]  ;;  %v214_v49 = vld [vmem:[%s913_s1 + $0x8] sm:$0xff] }
  0x1b   : > { %340 = vmatpush.msra.mxu1 %v237_v22  ;;  %378 = vmatpush.msra.mxu3 %v271_v32  ;;  %v231_v46 = vld [vmem:[%s913_s1 + $0x90] sm:$0xff]  ;;  %v230_v50 = vld [vmem:[%s913_s1 + $0x88] sm:$0xff]  ;;  %v249_v51 = vld [vmem:[%s913_s1 + $0x120] sm:$0xff] }
  0x1c   : > { %321 = vmatpush.msra.mxu0 %v220_v25  ;;  %359 = vmatpush.msra.mxu2 %v254_v31  ;;  %v267_v48 = vld [vmem:[%s913_s1 + $0x1b0] sm:$0xff]  ;;  %v266_v52 = vld [vmem:[%s913_s1 + $0x1a8] sm:$0xff]  ;;  %v213_v53 = vld [vmem:[%s913_s1] sm:$0xff] }
  0x1d   : > { %341 = vmatpush.msra.mxu1 %v236_v26  ;;  %379 = vmatpush.msra.mxu3 %v270_v36  ;;  %v229_v54 = vld [vmem:[%s913_s1 + $0x80] sm:$0xff]  ;;  %v292_v55 = vld [vmem:[%s913_s1 + $0x278] sm:$0xff]  ;;  %v291_v59 = vld [vmem:[%s913_s1 + $0x270] sm:$0xff] }
  0x1e   : > { %322 = vmatpush.msra.mxu0 %v219_v29  ;;  %360 = vmatpush.msra.mxu2 %v253_v35  ;;  %v308_v56 = vld [vmem:[%s913_s1 + $0x2f8] sm:$0xff]  ;;  %v265_v58 = vld [vmem:[%s913_s1 + $0x1a0] sm:$0xff]  ;;  %v307_v60 = vld [vmem:[%s913_s1 + $0x2f0] sm:$0xff] }
  0x1f   : > { %342 = vmatpush.msra.mxu1 %v235_v30  ;;  %380 = vmatpush.msra.mxu3 %v269_v40  ;;  %v248_v57 = vld [vmem:[%s913_s1 + $0x118] sm:$0xff]  ;;  %v247_v61 = vld [vmem:[%s913_s1 + $0x110] sm:$0xff]  ;;  %v290_v63 = vld [vmem:[%s913_s1 + $0x268] sm:$0xff] }
  0x20   : > { %323 = vmatpush.msra.mxu0 %v218_v33  ;;  %361 = vmatpush.msra.mxu2 %v252_v39  ;;  %v264_v62 = vld [vmem:[%s913_s1 + $0x198] sm:$0xff]  ;;  %v306_v0 = vld [vmem:[%s913_s1 + $0x2e8] sm:$0xff]  ;;  %v263_v2 = vld [vmem:[%s913_s1 + $0x190] sm:$0xff] }
  0x21   : > { %343 = vmatpush.msra.mxu1 %v234_v34  ;;  %381 = vmatpush.msra.mxu3 %v268_v44  ;;  %v246_v1 = vld [vmem:[%s913_s1 + $0x108] sm:$0xff]  ;;  %v289_v3 = vld [vmem:[%s913_s1 + $0x260] sm:$0xff]  ;;  %v288_v7 = vld [vmem:[%s913_s1 + $0x258] sm:$0xff] }
  0x22   : > { %324 = vmatpush.msra.mxu0 %v217_v37  ;;  %362 = vmatpush.msra.mxu2 %v251_v43  ;;  %v305_v4 = vld [vmem:[%s913_s1 + $0x2e0] sm:$0xff]  ;;  %v262_v6 = vld [vmem:[%s913_s1 + $0x188] sm:$0xff]  ;;  %v304_v8 = vld [vmem:[%s913_s1 + $0x2d8] sm:$0xff] }
  0x23   : > { %344 = vmatpush.msra.mxu1 %v233_v38  ;;  %382 = vmatpush.msra.mxu3 %v267_v48  ;;  %v245_v5 = vld [vmem:[%s913_s1 + $0x100] sm:$0xff]  ;;  %v209_v9 = vld [vmem:[%s810_s13 + $0x10] sm:$0xff]  ;;  %v210_v14 = vld [vmem:[%s810_s13 + $0x18] sm:$0xff] }
  0x24   : > { %325 = vmatpush.msra.mxu0 %v216_v41  ;;  %363 = vmatpush.msra.mxu2 %v250_v47  ;;  %v261_v10 = vld [vmem:[%s913_s1 + $0x180] sm:$0xff]  ;;  %v287_v11 = vld [vmem:[%s913_s1 + $0x250] sm:$0xff]  ;;  %v286_v15 = vld [vmem:[%s913_s1 + $0x248] sm:$0xff] }
  0x25   : > { %345 = vmatpush.msra.mxu1 %v232_v42  ;;  %383 = vmatpush.msra.mxu3 %v266_v52  ;;  %v303_v12 = vld [vmem:[%s913_s1 + $0x2d0] sm:$0xff]  ;;  %v207_v13 = vld [vmem:[%s810_s13] sm:$0xff]  ;;  %v302_v16 = vld [vmem:[%s913_s1 + $0x2c8] sm:$0xff] }
  0x26   : > { %326 = vmatpush.msra.mxu0 %v215_v45  ;;  %364 = vmatpush.msra.mxu2 %v249_v51  ;;  %v208_v17 = vld [vmem:[%s810_s13 + $0x8] sm:$0xff]  ;;  %v285_v18 = vld [vmem:[%s913_s1 + $0x240] sm:$0xff]  ;;  %v284_v20 = vld [vmem:[%s913_s1 + $0x238] sm:$0xff] }
  0x27   : > { %346 = vmatpush.msra.mxu1 %v231_v46  ;;  %384 = vmatpush.msra.mxu3 %v265_v58  ;;  %v301_v19 = vld [vmem:[%s913_s1 + $0x2c0] sm:$0xff]  ;;  %v300_v21 = vld [vmem:[%s913_s1 + $0x2b8] sm:$0xff]  ;;  %v283_v22 = vld [vmem:[%s913_s1 + $0x230] sm:$0xff] }
  0x28   : > { %327 = vmatpush.msra.mxu0 %v214_v49  ;;  %365 = vmatpush.msra.mxu2 %v248_v57  ;;  %v299_v23 = vld [vmem:[%s913_s1 + $0x2b0] sm:$0xff]  ;;  %v282_v24 = vld [vmem:[%s913_s1 + $0x228] sm:$0xff]  ;;  %v281_v26 = vld [vmem:[%s913_s1 + $0x220] sm:$0xff] }
  0x29   : > { %347 = vmatpush.msra.mxu1 %v230_v50  ;;  %385 = vmatpush.msra.mxu3 %v264_v62  ;;  %v298_v25 = vld [vmem:[%s913_s1 + $0x2a8] sm:$0xff]  ;;  %v297_v27 = vld [vmem:[%s913_s1 + $0x2a0] sm:$0xff]  ;;  %v280_v28 = vld [vmem:[%s913_s1 + $0x218] sm:$0xff] }
  0x2a   : > { %328 = vmatpush.msra.mxu0 %v213_v53  ;;  %366 = vmatpush.msra.mxu2 %v247_v61  ;;  %v296_v29 = vld [vmem:[%s913_s1 + $0x298] sm:$0xff]  ;;  %v279_v30 = vld [vmem:[%s913_s1 + $0x210] sm:$0xff]  ;;  %v278_v32 = vld [vmem:[%s913_s1 + $0x208] sm:$0xff] }
  0x2b   : > { %348 = vmatpush.msra.mxu1 %v229_v54  ;;  %386 = vmatpush.msra.mxu3 %v263_v2  ;;  %v295_v31 = vld [vmem:[%s913_s1 + $0x290] sm:$0xff]  ;;  %v294_v33 = vld [vmem:[%s913_s1 + $0x288] sm:$0xff]  ;;  %v277_v34 = vld [vmem:[%s913_s1 + $0x200] sm:$0xff] }
  0x2c   : > { %393 = vmatpush.msrb.mxu0 %v292_v55  ;;  %367 = vmatpush.msra.mxu2 %v246_v1  ;;  %v293_v35 = vld [vmem:[%s913_s1 + $0x280] sm:$0xff]  ;;  %v212_v37 = vld [vmem:[%s810_s13 + $0x28] sm:$0xff] }
  0x2d   : > { %413 = vmatpush.msrb.mxu1 %v308_v56  ;;  %387 = vmatpush.msra.mxu3 %v262_v6  ;;  %v211_v36 = vld [vmem:[%s810_s13 + $0x20] sm:$0xff] }
  0x2e   : > { %394 = vmatpush.msrb.mxu0 %v291_v59  ;;  %368 = vmatpush.msra.mxu2 %v245_v5  ;;  %v544_v38 = vld [vmem:[%s914_s2] ss:$0 sm:$0xff] }
  0x2f   : > { %414 = vmatpush.msrb.mxu1 %v307_v60  ;;  %369 = vmatmul.f32.vlgmr.msra.gmra.mxu2 %v209_v9 }
  0x30   : > { %395 = vmatpush.msrb.mxu0 %v290_v63  ;;  %388 = vmatpush.msra.mxu3 %v261_v10 }
  0x31   : > { %415 = vmatpush.msrb.mxu1 %v306_v0  ;;  %329 = vmatmul.f32.vlgmr.msra.gmra.mxu0 %v207_v13 }
  0x32   : > { %396 = vmatpush.msrb.mxu0 %v289_v3  ;;  %389 = vmatmul.f32.vlgmr.msra.gmra.mxu3 %v210_v14 }
  0x33   : > { %416 = vmatpush.msrb.mxu1 %v305_v4 }
  0x34   : > { %397 = vmatpush.msrb.mxu0 %v288_v7  ;;  %349 = vmatmul.f32.vlgmr.msra.gmra.mxu1 %v208_v17 }
  0x35   : > { %417 = vmatpush.msrb.mxu1 %v304_v8 }
  0x36   : > { %398 = vmatpush.msrb.mxu0 %v287_v11 }
  0x37   : > { %418 = vmatpush.msrb.mxu1 %v303_v12 }
  0x38   : > { %399 = vmatpush.msrb.mxu0 %v286_v15 }
  0x39   : > { %419 = vmatpush.msrb.mxu1 %v302_v16 }
  0x3a   : > { %400 = vmatpush.msrb.mxu0 %v285_v18 }
  0x3b   : > { %420 = vmatpush.msrb.mxu1 %v301_v19 }
  0x3c   : > { %401 = vmatpush.msrb.mxu0 %v284_v20 }
  0x3d   : > { %421 = vmatpush.msrb.mxu1 %v300_v21 }
  0x3e   : > { %402 = vmatpush.msrb.mxu0 %v283_v22 }
  0x3f   : > { %422 = vmatpush.msrb.mxu1 %v299_v23 }
  0x40   : > { %403 = vmatpush.msrb.mxu0 %v282_v24 }
  0x41   : > { %423 = vmatpush.msrb.mxu1 %v298_v25 }
  0x42   : > { %404 = vmatpush.msrb.mxu0 %v281_v26 }
  0x43   : > { %424 = vmatpush.msrb.mxu1 %v297_v27 }
  0x44   : > { %405 = vmatpush.msrb.mxu0 %v280_v28 }
  0x45   : > { %425 = vmatpush.msrb.mxu1 %v296_v29 }
  0x46   : > { %406 = vmatpush.msrb.mxu0 %v279_v30 }
  0x47   : > { %426 = vmatpush.msrb.mxu1 %v295_v31 }
  0x48   : > { %407 = vmatpush.msrb.mxu0 %v278_v32 }
  0x49   : > { %427 = vmatpush.msrb.mxu1 %v294_v33 }
  0x4a   : > { %408 = vmatpush.msrb.mxu0 %v277_v34 }
  0x4b   : > { %428 = vmatpush.msrb.mxu1 %v293_v35  ;;  %409 = vmatmul.f32.vlgmr.msrb.gmra.mxu0 %v211_v36 }
  0x4c   : > { %429 = vmatmul.f32.vlgmr.msrb.gmra.mxu1 %v212_v37 }
  0xae   : > { %v330_v39 = vpop.f32.mrf.mxu0 }
  0xaf   : > { %v331_v40 = vadd.f32 %v544_v38, %v330_v39 }
  0xb1   : > { %v350_v41 = vpop.f32.mrf.mxu1 }
  0xb2   : > { %v351_v42 = vadd.f32 %v350_v41, %v331_v40  ;;  %v370_v43 = vpop.f32.mrf.mxu2 }
  0xb4   : > { %v371_v44 = vadd.f32 %v370_v43, %v351_v42 }
  0xb5   : > { %v390_v45 = vpop.f32.mrf.mxu3 }
  0xb6   : > { %v391_v46 = vadd.f32 %v390_v45, %v371_v44 }
  0xc8   : > { %v410_v47 = vpop.f32.mrf.mxu0 }
  0xc9   : > { %v430_v48 = vpop.f32.mrf.mxu1  ;;  %v411_v49 = vadd.f32 %v410_v47, %v391_v46 }
  0xcb   : > { %v431_v50 = vadd.f32 %v430_v48, %v411_v49 }
  0xcd   : > { %436 = vrot.lane.b32.xlu0 %v431_v50, %s553_s29  ;;  %434 = vst.msk [vmem:[%s202_s28] sm:$0xff] %vm433_vm0, %v431_v50 }
 0x13f   : > { %v437_v51 = vpop.permute.xlu0 %436 }
 0x140   : > { %439 = vst.msk [vmem:[%s206_s6] sm:$0xff] %vm433_vm0, %v437_v51 }
 0x141 PF: > { %s15_s15 = sadd.s32 1, %s551_s15  }
 0x142   : > { %p12_p4 = scmp.ge.s32.totalorder %s15_s15, 4  }
 0x144   :  { %14 = sbr.rel (!%p12_p4) target bundleno = 1 (0x1), region = 74 }

</bundles_post_ra>
